<compile_context>
chip_gen: v6e
topology: v6e:2x2x1
jax: 0.10.0
libtpu: 0.0.40
codegen_flags: <defaults>
</compile_context>

<pallas_src>
import functools

import numpy as np
import jax
import jax.numpy as jnp
from jax.experimental import pallas as pl
from jax.experimental.pallas import tpu as pltpu

# ---------------- small deterministic configuration ----------------
BATCH = 2
N_POINTS = 64               # signal length (== n_fft of the Gaussian STFT)
HOP = 4                     # hop_length
N_MELS = 8
SAMPLE_RATE = 16000
N_CLASSES = 4
INIT_LAMBD = 5.0            # Gaussian window width parameter (sigma)
F_MIN = 0.0
F_MAX = SAMPLE_RATE / 2
P_DROP = 0.2
ENERGY_NORMALIZE = False    # module default
NORMALIZE_WINDOW = False    # module default

N_FFT = N_POINTS
N_FREQ = N_FFT // 2 + 1                 # onesided rFFT bins (33)
N_TIME = N_POINTS // HOP + 1            # torch.stft(center=True) frame count (17)
D_FLAT = N_MELS * N_TIME                # fc input features (136)
F_PAD = ((N_FREQ + 7) // 8) * 8         # sublane-aligned freq count (40), zero padded


# ---------------- host-side constants (built once at import) ----------------
def _hz_to_mel(f):   # HTK scale (torchaudio melscale_fbanks default)
    return 2595.0 * np.log10(1.0 + f / 700.0)


def _mel_to_hz(m):
    return 700.0 * (10.0 ** (m / 2595.0) - 1.0)


def _melscale_fbanks(n_freqs, f_min, f_max, n_mels, sample_rate):
    # reimplementation of torchaudio.functional.melscale_fbanks(norm=None, mel_scale='htk')
    all_freqs = np.linspace(0.0, sample_rate / 2, n_freqs)
    m_pts = np.linspace(_hz_to_mel(f_min), _hz_to_mel(f_max), n_mels + 2)
    f_pts = _mel_to_hz(m_pts)
    f_diff = f_pts[1:] - f_pts[:-1]
    slopes = f_pts[None, :] - all_freqs[:, None]        # (n_freqs, n_mels + 2)
    down = -slopes[:, :-2] / f_diff[:-1]
    up = slopes[:, 2:] / f_diff[1:]
    fb = np.maximum(0.0, np.minimum(down, up))
    return fb.astype(np.float32)                        # (n_freqs, n_mels)


def _dft_basis_stacked():
    # rows [0:N_FREQ)           -> cos basis
    # rows [F_PAD:F_PAD+N_FREQ) -> -sin basis
    # remaining rows zero (sublane alignment padding; F_PAD % 8 == 0 keeps the
    # re/im split an aligned, copy-free view)
    k = np.arange(N_FREQ, dtype=np.float64)[:, None]
    n = np.arange(N_FFT, dtype=np.float64)[None, :]
    ang = 2.0 * np.pi * k * n / N_FFT
    basis = np.zeros((2 * F_PAD, N_FFT), dtype=np.float32)
    basis[:N_FREQ] = np.cos(ang)
    basis[F_PAD:F_PAD + N_FREQ] = -np.sin(ang)
    return basis


_BASIS_NP = _dft_basis_stacked()                               # (2*F_PAD, N_FFT)
_MEL_T_NP = np.zeros((N_MELS, F_PAD), dtype=np.float32)        # (N_MELS, F_PAD)
_MEL_T_NP[:, :N_FREQ] = _melscale_fbanks(N_FREQ, F_MIN, F_MAX, N_MELS, SAMPLE_RATE).T


# ---------------- Pallas kernel: |Gaussian STFT|^2 + mel projection ----------------
def mel_spec_kernel(frames_ref, basis_ref, melT_ref, s_ref):
    # frames_ref : (N_FFT, LANES)     windowed frames, batch*time packed on lanes,
    #                                 zero-padded to a multiple of 128 lanes
    # basis_ref  : (2*F_PAD, N_FFT)   stacked [cos; 0; -sin; 0] DFT basis (constant)
    # melT_ref   : (N_MELS, F_PAD)    mel filterbank^T, zero-padded freq columns
    # s_ref      : (N_MELS, LANES)    mel power spectrogram, lane-dense
    # TODO(synk): DFT via f32 MXU matmul (multi-pass bf16 emulation) is not
    # bit-exact vs torch FFT; bf16 inputs (v6e/v7x MXU win) would widen that gap.
    reim = jnp.dot(basis_ref[...], frames_ref[...],
                   preferred_element_type=jnp.float32)          # (2*F_PAD, LANES)
    re = reim[:F_PAD, :]                                        # aligned sublane views
    im = reim[F_PAD:, :]
    spec = re * re + im * im                                    # |STFT|^2, (F_PAD, LANES)
    s_ref[...] = jnp.dot(melT_ref[...], spec,
                         preferred_element_type=jnp.float32)    # (N_MELS, LANES)


def mel_spectrogram_pallas(frames, basis, mel_t):
    lanes = frames.shape[1]
    vmem = lambda: pl.BlockSpec(memory_space=pltpu.MemorySpace.VMEM)
    return pl.pallas_call(
        mel_spec_kernel,
        out_shape=jax.ShapeDtypeStruct((N_MELS, lanes), jnp.float32),
        in_specs=[vmem(), vmem(), vmem()],
        out_specs=vmem(),
    )(frames, basis, mel_t)


# ---------------- plain-JAX glue (framing, window, dropout, FC) ----------------
def _frame_signal(x):
    # per-sample mean removal + torch.stft(center=True, pad_mode='reflect') framing
    xc = x - jnp.mean(x, axis=1, keepdims=True)
    pad = N_FFT // 2
    xp = jnp.pad(xc, ((0, 0), (pad, pad)), mode="reflect")
    idx = jnp.arange(N_TIME)[None, :] * HOP + jnp.arange(N_FFT)[:, None]   # (n_fft, n_time)
    return xp[:, idx]                                                      # (B, n_fft, n_time)


@functools.partial(jax.jit, static_argnames=("training",))
def mel_linear_net_forward(x, lambd, fc_w, fc_b, drop_key, training=True):
    B = x.shape[0]
    lanes = ((B * N_TIME + 127) // 128) * 128          # lane-dense padding (>= 128)

    # Gaussian window with learnable width |lambd|, folded into the frames
    # (mathematically identical to windowing the basis; keeps basis constant).
    sigma = jnp.abs(lambd)
    t = jnp.arange(N_FFT, dtype=jnp.float32) - N_FFT / 2.0
    window = jnp.exp(-0.5 * jnp.square(t / sigma))
    if NORMALIZE_WINDOW:
        window = window / jnp.sum(window)

    frames = _frame_signal(x) * window[None, :, None]           # (B, n_fft, n_time)
    frames = jnp.transpose(frames, (1, 0, 2)).reshape(N_FFT, B * N_TIME)
    frames = jnp.pad(frames, ((0, 0), (0, lanes - B * N_TIME)))  # (n_fft, lanes)

    basis = jnp.asarray(_BASIS_NP)
    mel_t = jnp.asarray(_MEL_T_NP)
    s_packed = mel_spectrogram_pallas(frames, basis, mel_t)     # (N_MELS, lanes)

    # un-pack lanes -> (B, 1, N_MELS, N_TIME); lane index was b*N_TIME + t
    mel = s_packed[:, :B * N_TIME].reshape(N_MELS, B, N_TIME)
    s = jnp.transpose(mel, (1, 0, 2))[:, None]                  # (B, 1, N_MELS, N_TIME)
    if ENERGY_NORMALIZE:
        s = jnp.log(s + 1.0)

    # dropout + fc in the wrapper: ~2 KFLOP, no HBM traffic saved by fusing,
    # and it removes the XLU-reduce/concat epilogue from the kernel.
    # TODO(synk): jax.random cannot reproduce PyTorch's dropout bitstream; only
    # the Bernoulli(1-p) keep probability and 1/(1-p) scaling semantics match.
    z = s.reshape(B, N_MELS * N_TIME)                           # m*T + t flatten order
    if training:
        keep = jax.random.bernoulli(drop_key, 1.0 - P_DROP, z.shape)
        z = jnp.where(keep, z / (1.0 - P_DROP), 0.0)
    logits = z @ fc_w.T + fc_b
    return logits, s


if __name__ == "__main__":
    key = jax.random.PRNGKey(0)
    kx, kw, kb, kd = jax.random.split(key, 4)

    # example input: batch of raw waveforms
    x = jax.random.normal(kx, (BATCH, N_POINTS), dtype=jnp.float32)

    # deterministic parameters (nn.Parameter lambd, nn.Linear weight/bias init range)
    lambd = jnp.float32(INIT_LAMBD)
    bound = 1.0 / np.sqrt(D_FLAT)
    fc_w = jax.random.uniform(kw, (N_CLASSES, D_FLAT), jnp.float32, -bound, bound)
    fc_b = jax.random.uniform(kb, (N_CLASSES,), jnp.float32, -bound, bound)

    logits, s = mel_linear_net_forward(x, lambd, fc_w, fc_b, kd, training=True)
    jax.block_until_ready((logits, s))

    assert logits.shape == (BATCH, N_CLASSES)
    assert s.shape == (BATCH, 1, N_MELS, N_TIME)
    assert bool(jnp.all(jnp.isfinite(logits))) and bool(jnp.all(jnp.isfinite(s)))
    print("KERNEL_OK")
</pallas_src>

<mosaic_0001>
module attributes {stable_mosaic.version = 11 : i64} {
  func.func @mel_spec_kernel(%arg0: memref<64x128xf32, #tpu.memory_space<vmem>>, %arg1: memref<80x64xf32, #tpu.memory_space<vmem>>, %arg2: memref<8x40xf32, #tpu.memory_space<vmem>>, %arg3: memref<8x128xf32, #tpu.memory_space<vmem>>) attributes {dimension_semantics = [], scalar_prefetch = 0 : i64, scratch_operands = 0 : i64, tpu.core_type = #tpu.core_type<tc>} {
    %c0 = arith.constant 0 : index
    %c0_0 = arith.constant 0 : index
    %0 = vector.load %arg1[%c0, %c0_0] : memref<80x64xf32, #tpu.memory_space<vmem>>, vector<80x64xf32>
    %c0_1 = arith.constant 0 : index
    %c0_2 = arith.constant 0 : index
    %1 = vector.load %arg0[%c0_1, %c0_2] : memref<64x128xf32, #tpu.memory_space<vmem>>, vector<64x128xf32>
    %cst = arith.constant dense<0.000000e+00> : vector<80x128xf32>
    %2 = tpu.matmul %0, %1, %cst {dimension_numbers = #tpu.dot_dimension_numbers<[1], [0], [0], [1], [0, 0, 1, 1], [], []>} : vector<80x64xf32>, vector<64x128xf32>, vector<80x128xf32> -> vector<80x128xf32>
    %3 = vector.extract_strided_slice %2 {offsets = [0, 0], sizes = [40, 128], strides = [1, 1]} : vector<80x128xf32> to vector<40x128xf32>
    %4 = vector.extract_strided_slice %2 {offsets = [40, 0], sizes = [40, 128], strides = [1, 1]} : vector<80x128xf32> to vector<40x128xf32>
    %5 = arith.mulf %3, %3 : vector<40x128xf32>
    %6 = arith.mulf %4, %4 : vector<40x128xf32>
    %7 = arith.addf %5, %6 : vector<40x128xf32>
    %c0_3 = arith.constant 0 : index
    %c0_4 = arith.constant 0 : index
    %8 = vector.load %arg2[%c0_3, %c0_4] : memref<8x40xf32, #tpu.memory_space<vmem>>, vector<8x40xf32>
    %cst_5 = arith.constant dense<0.000000e+00> : vector<8x128xf32>
    %9 = tpu.matmul %8, %7, %cst_5 {dimension_numbers = #tpu.dot_dimension_numbers<[1], [0], [0], [1], [0, 0, 1, 1], [], []>} : vector<8x40xf32>, vector<40x128xf32>, vector<8x128xf32> -> vector<8x128xf32>
    %c0_6 = arith.constant 0 : index
    %c0_7 = arith.constant 0 : index
    %10 = vector.load %arg3[%c0_6, %c0_7] : memref<8x128xf32, #tpu.memory_space<vmem>>, vector<8x128xf32>
    tpu.vector_store %arg3[%c0_6, %c0_7], %9 {strides = array<i32>} : memref<8x128xf32, #tpu.memory_space<vmem>>, vector<8x128xf32>,
    return
  }
}

</mosaic_0001>

<bundles_post_ra>
// kernel: mel_linear_net_forward.1
= control target key start
LH: loop header
LB: loop body
LE: loop exit
PB: predicated region body
PF: predicated region fallthrough
CT: control target
= control target key end

     0   :  { %vm32_vm0 = vcmask 523264   ;;  %v354_v18 = vmov 0.0   ;;  %vm355_vm1 = vmmov 0   ;;  %vm194_vm2 = vcmask 326656   ;;  %s446_s0 = inlined_call_operand.vmem [shape: f32[64,128], index: 0, kind: input, shape index: {}]   ;;  %s447_s1 = inlined_call_operand.vmem [shape: f32[80,64], index: 1, kind: input, shape index: {}]   ;;  %s448_s2 = inlined_call_operand.vmem [shape: f32[8,40], index: 2, kind: input, shape index: {}]   ;;  %s449_s3 = inlined_call_operand.vmem [shape: f32[8,128], index: 3, kind: output, shape index: {}]  }
   0x1   :  { %v31_v0 = vld [vmem:[%s446_s0 + $0x38] sm:$0xff]  ;;  %v30_v1 = vld [vmem:[%s446_s0 + $0x30] sm:$0xff]  ;;  %v29_v2 = vld [vmem:[%s446_s0 + $0x28] sm:$0xff]  ;;  %339 = vmatprep.subr.mxu1 %v354_v18  ;;  %349 = vmatprep.mubr.msk.f32.mxu1 %vm355_vm1, %v354_v18 }
   0x2   :  { %308 = vmatprep.subr.mxu0 %v31_v0  ;;  %v14_v3 = vld [vmem:[%s447_s1] sm:$0xff]  ;;  %v27_v5 = vld [vmem:[%s446_s0 + $0x18] sm:$0xff]  ;;  %v26_v6 = vld [vmem:[%s446_s0 + $0x10] sm:$0xff] }
   0x3   :  { %309 = vmatpush3.msra.mxu0 %v31_v0  ;;  %324 = vmatprep.mubr.msk.f32.mxu0 %vm32_vm0, %v14_v3  ;;  %v28_v4 = vld [vmem:[%s446_s0 + $0x20] sm:$0xff]  ;;  %v25_v7 = vld [vmem:[%s446_s0 + $0x8] sm:$0xff]  ;;  %v16_v10 = vld [vmem:[%s447_s1 + $0x10] sm:$0xff] }
   0x4   :  { %310 = vmatprep.subr.mxu0 %v30_v1  ;;  %v24_v8 = vld [vmem:[%s446_s0] sm:$0xff]  ;;  %v15_v9 = vld [vmem:[%s447_s1 + $0x8] sm:$0xff]  ;;  %v17_v11 = vld [vmem:[%s447_s1 + $0x18] sm:$0xff] }
   0x5   :  { %311 = vmatpush3.msra.mxu0 %v30_v1  ;;  %v18_v12 = vld [vmem:[%s447_s1 + $0x20] sm:$0xff]  ;;  %v19_v13 = vld [vmem:[%s447_s1 + $0x28] sm:$0xff]  ;;  %v20_v14 = vld [vmem:[%s447_s1 + $0x30] sm:$0xff] }
   0x6   :  { %312 = vmatprep.subr.mxu0 %v29_v2  ;;  %v21_v15 = vld [vmem:[%s447_s1 + $0x38] sm:$0xff]  ;;  %v22_v16 = vld [vmem:[%s447_s1 + $0x40] sm:$0xff]  ;;  %v23_v17 = vld [vmem:[%s447_s1 + $0x48] sm:$0xff] }
   0x7   :  { %313 = vmatpush3.msra.mxu0 %v29_v2  ;;  %v193_v44 = vld [vmem:[%s448_s2] sm:$0xff] }
   0x8   :  { %314 = vmatprep.subr.mxu0 %v28_v4 }
   0x9   :  { %315 = vmatpush3.msra.mxu0 %v28_v4 }
   0xa   :  { %316 = vmatprep.subr.mxu0 %v27_v5 }
   0xb   :  { %317 = vmatpush3.msra.mxu0 %v27_v5 }
   0xc   :  { %318 = vmatprep.subr.mxu0 %v26_v6 }
   0xd   :  { %319 = vmatpush3.msra.mxu0 %v26_v6 }
   0xe   :  { %320 = vmatprep.subr.mxu0 %v25_v7 }
   0xf   :  { %321 = vmatpush3.msra.mxu0 %v25_v7 }
  0x10   :  { %322 = vmatprep.subr.mxu0 %v24_v8 }
  0x11   :  { %323 = vmatpush3.msra.mxu0 %v24_v8 }
  0x12   :  { %325 = vmatmul.mubr.msk.f32.vlgmr.msra.gmra.mxu0 %vm32_vm0, %v15_v9 }
  0x13   :  { %327 = vmatprep.mubr.msk.f32.mxu0 %vm32_vm0, %v16_v10 }
  0x16   :  { %328 = vmatmul.mubr.msk.f32.gmra.mxu0 %vm32_vm0, %v17_v11 }
  0x17   :  { %330 = vmatprep.mubr.msk.f32.mxu0 %vm32_vm0, %v18_v12 }
  0x1a   :  { %331 = vmatmul.mubr.msk.f32.gmra.mxu0 %vm32_vm0, %v19_v13 }
  0x1b   :  { %333 = vmatprep.mubr.msk.f32.mxu0 %vm32_vm0, %v20_v14 }
  0x1e   :  { %334 = vmatmul.mubr.msk.f32.gmra.mxu0 %vm32_vm0, %v21_v15 }
  0x1f   :  { %336 = vmatprep.mubr.msk.f32.mxu0 %vm32_vm0, %v22_v16 }
  0x22   :  { %337 = vmatmul.mubr.msk.f32.gmra.mxu0 %vm32_vm0, %v23_v17 }
  0xd2   :  { %v326_v19 = vpop.f32.mrf.mxu0 }
  0xd3   :  { %v179_v38 = vmul.f32 %v326_v19, %v326_v19 }
  0xd4   :  { %v129_v20 = vpop.f32.mrf.mxu0 }
  0xd5   :  { %v178_v41 = vmul.f32 %v129_v20, %v129_v20 }
  0xd6   :  { %v329_v21 = vpop.f32.mrf.mxu0 }
  0xd7   :  { %v181_v31 = vmul.f32 %v329_v21, %v329_v21 }
  0xd8   :  { %v139_v22 = vpop.f32.mrf.mxu0 }
  0xd9   :  { %v180_v35 = vmul.f32 %v139_v22, %v139_v22 }
  0xda   :  { %v332_v23 = vpop.f32.mrf.mxu0 }
  0xdb   :  { %v183_v39 = vmul.f32 %v332_v23, %v332_v23 }
  0xdc   :  { %v149_v24 = vpop.f32.mrf.mxu0 }
  0xdd   :  { %v182_v28 = vmul.f32 %v149_v24, %v149_v24  ;;  %v188_v43 = vadd.f32 %v183_v39, %v178_v41 }
  0xde   :  { %v335_v25 = vpop.f32.mrf.mxu0 }
  0xdf   :  { %v185_v32 = vmul.f32 %v335_v25, %v335_v25 }
  0xe0   :  { %v159_v26 = vpop.f32.mrf.mxu0 }
  0xe1   :  { %v184_v36 = vmul.f32 %v159_v26, %v159_v26  ;;  %v190_v40 = vadd.f32 %v185_v32, %v180_v35 }
  0xe2   :  { %v338_v27 = vpop.f32.mrf.mxu0 }
  0xe3   :  { %v187_v29 = vmul.f32 %v338_v27, %v338_v27  ;;  %v189_v42 = vadd.f32 %v184_v36, %v179_v38 }
  0xe4   :  { %v169_v30 = vpop.f32.mrf.mxu0 }
  0xe5   :  { %v186_v33 = vmul.f32 %v169_v30, %v169_v30  ;;  %v192_v34 = vadd.f32 %v187_v29, %v182_v28 }
  0xe7   :  { %v191_v37 = vadd.f32 %v186_v33, %v181_v31  ;;  %340 = vmatpush3.msra.mxu1 %v192_v34 }
  0xe8   :  { %341 = vmatprep.subr.mxu1 %v354_v18 }
  0xe9   :  { %342 = vmatpush3.msra.mxu1 %v191_v37 }
  0xea   :  { %343 = vmatprep.subr.mxu1 %v354_v18 }
  0xeb   :  { %344 = vmatpush3.msra.mxu1 %v190_v40 }
  0xec   :  { %345 = vmatprep.subr.mxu1 %v354_v18 }
  0xed   :  { %346 = vmatpush3.msra.mxu1 %v189_v42 }
  0xee   :  { %347 = vmatprep.subr.mxu1 %v354_v18 }
  0xef   :  { %348 = vmatpush3.msra.mxu1 %v188_v43 }
  0xf0   :  { %350 = vmatmul.mubr.msk.f32.vlgmr.msra.gmra.mxu1 %vm194_vm2, %v193_v44 }
 0x1b0   :  { %v264_v45 = vpop.f32.mrf.mxu1 }
 0x1b1   :  { %268 = vst [vmem:[%s449_s3] sm:$0xff] %v264_v45 }
 0x1b2   :  { %v351_v46 = vpop.f32.mrf.mxu1 }

</bundles_post_ra>
